<compile_context>
chip_gen: v7x
topology: tpu7x:2x2x1
jax: 0.10.0
libtpu: 0.0.40
codegen_flags: <defaults>
</compile_context>

<pallas_src>
import functools

import jax
import jax.numpy as jnp
import numpy as np
from jax.experimental import pallas as pl
from jax.experimental.pallas import tpu as pltpu


def _round_up(x, m):
    return ((x + m - 1) // m) * m


def _attn_pooling_kernel(h_ref, w1_ref, b1_ref, w2_ref, b2_ref, o_ref, *, n_valid):
    bt, n_p, fp = h_ref.shape

    h3 = h_ref[...]                                    # [bt, Np, Fp]  (bf16 or f32)
    # bt and Np are multiples of 8 -> collapsing them is layout-preserving.
    h2 = h3.reshape(bt * n_p, fp)

    # fc1 + tanh: MXU (bf16 in, f32 accumulate), tanh on the EUP in f32.
    z = jnp.tanh(
        jnp.dot(h2, w1_ref[...], preferred_element_type=jnp.float32) + b1_ref[...]
    )                                                  # [bt*Np, D] f32

    # fc2 (tiny D x H, f32 MXU).
    s = jnp.dot(z, w2_ref[...], preferred_element_type=jnp.float32) + b2_ref[...]
    s = s.reshape(bt, n_p, -1)                         # [bt, Np, H]

    # Mask padded node rows (node index >= n_valid) before the softmax.
    if n_p != n_valid:
        node_idx = jax.lax.broadcasted_iota(jnp.int32, s.shape, 1)
        s = jnp.where(node_idx < n_valid, s, jnp.float32(-1e30))

    # softmax over the node axis (dgl.softmax_nodes), per graph, per head.
    m = jnp.max(s, axis=1, keepdims=True)              # [bt, 1, H]
    e = jnp.exp(s - m)                                 # [bt, Np, H]
    denom = jnp.sum(e, axis=1, keepdims=True)          # [bt, 1, H]
    a = e * pl.reciprocal(denom, approx=True)          # [bt, Np, H]  (EUP vrcp)

    # mean over heads -> per-node scalar weight, then weighted node-sum on the
    # VPU (broadcast mul) + XLU (sublane reduce).  No MXU, no relayout.
    w = jnp.mean(a, axis=2, keepdims=True)             # [bt, Np, 1]
    pooled = jnp.sum(w * h3.astype(jnp.float32), axis=1)   # [bt, Fp] f32
    o_ref[...] = pooled.astype(o_ref.dtype)


def _step_vmem_bytes(bt, n_p, f_p, d_feat, n_heads, h_item_bytes):
    """Conservative per-grid-step VMEM footprint (buffers + intermediates)."""
    lane = 128
    d_pad = max(_round_up(d_feat, lane), lane)
    h_pad = max(_round_up(n_heads, lane), lane)
    nodes = bt * n_p
    est = 0
    est += 2 * bt * n_p * f_p * h_item_bytes            # h tile, double-buffered
    est += 2 * bt * f_p * 4                              # out tile, double-buffered
    est += 2 * (f_p * d_pad + 8 * d_pad + d_pad * h_pad + 8 * h_pad) * 4  # weights/biases
    est += nodes * d_pad * 4                             # z (fc1 activations, lane-padded)
    est += 3 * bt * n_p * h_pad * 4                      # s / e / a (lane-padded heads)
    est += 2 * bt * n_p * f_p * 4                        # f32 upcast of h + weighted product
    return est


def attn_pooling(h, w1, b1, w2, b2, *, block_graphs=None,
                 compute_dtype=jnp.bfloat16,
                 target_block_bytes=4 << 20,
                 vmem_budget_bytes=24 << 20):
    """h: [B, N, F]; w1: [F, D]; b1: [D]; w2: [D, H]; b2: [H] -> [B, F] (f32).

    Equal-sized graphs (N nodes each) stand in for the DGL batched graph.
    # TODO(synk): ragged DGL batches need scalar-prefetched per-graph node
    # counts (masking already in place for a single static count per block).
    """
    B, N, F = h.shape
    D = w1.shape[1]
    H = w2.shape[1]

    Fp = _round_up(F, 128)       # lane-dense feature dim (zero-padding is exact)
    Np = _round_up(N, 8)         # sublane-aligned node dim (masked pre-softmax)
    h_bytes = np.dtype(compute_dtype).itemsize

    def fits(bt_):
        return (_step_vmem_bytes(bt_, Np, Fp, D, H, h_bytes) <= vmem_budget_bytes
                and bt_ * Np * Fp * h_bytes <= target_block_bytes)

    max_bt = _round_up(B, 8)
    if block_graphs is None:
        bt = 8                   # minimum sublane-dense output tile
        cand = 16
        while cand <= max_bt and fits(cand):
            bt = cand
            cand += 8
        # Keep >= 2 grid steps when possible so v7x megacore has work for
        # both TensorCores (no-op on single-TC v5e/v6e).
        while bt > 8 and pl.cdiv(B, bt) < 2:
            bt = max(8, ((bt // 2) // 8) * 8)
    else:
        bt = int(block_graphs)
        if bt <= 0 or bt % 8 != 0:
            raise ValueError(
                f"block_graphs must be a positive multiple of 8 (got {block_graphs}); "
                "the (bt, Fp) output tile must be sublane-dense.")

    Bp = _round_up(B, bt)

    # Explicit scoped-VMEM limit: safe floor above v5e's 16 MiB default, well
    # under every chip's physical VMEM (64 MiB on v7x).
    # TODO(synk): node-chunked online-softmax fallback for graphs whose
    # minimal (8, Np, Fp) tile still exceeds this limit.
    vmem_est = _step_vmem_bytes(bt, Np, Fp, D, H, h_bytes)
    vmem_limit = int(min(max(vmem_est * 5 // 4, 32 << 20), 48 << 20))

    # bf16 stream for the dominant HBM traffic (h) and the fc1 weight; small
    # fc2 weights/biases stay f32 (all in-kernel elementwise math is f32).
    h_p = h.astype(compute_dtype)
    if (Bp, Np, Fp) != (B, N, F):
        h_p = jnp.pad(h_p, ((0, Bp - B), (0, Np - N), (0, Fp - F)))
    w1_p = w1.astype(compute_dtype)
    if Fp != F:
        w1_p = jnp.pad(w1_p, ((0, Fp - F), (0, 0)))
    b1_2d = b1.reshape(1, D).astype(jnp.float32)
    w2_f = w2.astype(jnp.float32)
    b2_2d = b2.reshape(1, H).astype(jnp.float32)

    kernel = functools.partial(_attn_pooling_kernel, n_valid=N)

    out_p = pl.pallas_call(
        kernel,
        out_shape=jax.ShapeDtypeStruct((Bp, Fp), jnp.float32),
        grid_spec=pltpu.PrefetchScalarGridSpec(
            num_scalar_prefetch=0,
            grid=(Bp // bt,),
            in_specs=[
                pl.BlockSpec((bt, Np, Fp), lambda i: (i, 0, 0)),
                pl.BlockSpec((Fp, D), lambda i: (0, 0)),   # grid-invariant weights
                pl.BlockSpec((1, D), lambda i: (0, 0)),
                pl.BlockSpec((D, H), lambda i: (0, 0)),
                pl.BlockSpec((1, H), lambda i: (0, 0)),
            ],
            out_specs=pl.BlockSpec((bt, Fp), lambda i: (i, 0)),
        ),
        compiler_params=pltpu.CompilerParams(
            dimension_semantics=("parallel",),   # megacore sharding on v7x
            vmem_limit_bytes=vmem_limit,
        ),
    )(h_p, w1_p, b1_2d, w2_f, b2_2d)

    return out_p[:B, :F]


def attn_pooling_ref(h, w1, b1, w2, b2):
    # Pure-JAX reference mirroring the PyTorch/DGL forward (f32).
    z = jnp.tanh(jnp.einsum("bnf,fd->bnd", h, w1) + b1)
    s = jnp.einsum("bnd,dh->bnh", z, w2) + b2
    a = jax.nn.softmax(s, axis=1)                   # softmax over nodes per graph
    per_head = jnp.einsum("bnh,bnf->hbf", a, h)     # per-head weighted node sums
    return jnp.mean(per_head, axis=0)               # mean over heads


if __name__ == "__main__":
    B, N = 6, 12           # 6 graphs, 12 nodes each (exercises B-, N- and F-padding)
    F, D, H = 32, 16, 4    # in_features, dense_features, n_heads

    key = jax.random.PRNGKey(0)
    k_h, k_w1, k_b1, k_w2, k_b2 = jax.random.split(key, 5)

    h = jax.random.normal(k_h, (B, N, F), dtype=jnp.float32)

    # deterministic "Linear"-style init: U(-1/sqrt(fan_in), 1/sqrt(fan_in))
    lim1 = 1.0 / (F ** 0.5)
    lim2 = 1.0 / (D ** 0.5)
    w1 = jax.random.uniform(k_w1, (F, D), jnp.float32, -lim1, lim1)   # fc1.weight.T
    b1 = jax.random.uniform(k_b1, (D,), jnp.float32, -lim1, lim1)
    w2 = jax.random.uniform(k_w2, (D, H), jnp.float32, -lim2, lim2)   # fc2.weight.T
    b2 = jax.random.uniform(k_b2, (H,), jnp.float32, -lim2, lim2)

    ref = attn_pooling_ref(h, w1, b1, w2, b2)

    # f32 path: tight semantic check (only approx reciprocal loosens it).
    out_f32 = jax.block_until_ready(
        attn_pooling(h, w1, b1, w2, b2, compute_dtype=jnp.float32))
    assert out_f32.shape == (B, F)
    assert jnp.allclose(out_f32, ref, atol=2e-3, rtol=2e-3), "f32 kernel mismatch vs reference"

    # Default bf16 h/w1 stream: halves the dominant HBM traffic; looser tolerance.
    out_bf16 = jax.block_until_ready(attn_pooling(h, w1, b1, w2, b2))
    assert out_bf16.shape == (B, F)
    assert jnp.allclose(out_bf16, ref, atol=3e-2, rtol=3e-2), "bf16 kernel mismatch vs reference"

    print("KERNEL_OK")
</pallas_src>

<mosaic_0001>
module attributes {stable_mosaic.version = 11 : i64} {
  func.func @_attn_pooling_kernel(%arg0: i32, %arg1: memref<8x16x128xf32, #tpu.memory_space<vmem>>, %arg2: memref<128x16xf32, #tpu.memory_space<vmem>>, %arg3: memref<1x16xf32, #tpu.memory_space<vmem>>, %arg4: memref<16x4xf32, #tpu.memory_space<vmem>>, %arg5: memref<1x4xf32, #tpu.memory_space<vmem>>, %arg6: memref<8x128xf32, #tpu.memory_space<vmem>>) attributes {dimension_semantics = [#tpu.dimension_semantics<parallel>], iteration_bounds = array<i64: 1>, scalar_prefetch = 0 : i64, scratch_operands = 0 : i64, tpu.core_type = #tpu.core_type<tc>, window_params = [{transform_indices = @transform_0, window_bounds = array<i64: 8, 16, 128>}, {pipeline_mode = #tpu.pipeline_mode<synchronous>, transform_indices = @transform_1, window_bounds = array<i64: 128, 16>}, {pipeline_mode = #tpu.pipeline_mode<synchronous>, transform_indices = @transform_2, window_bounds = array<i64: 1, 16>}, {pipeline_mode = #tpu.pipeline_mode<synchronous>, transform_indices = @transform_3, window_bounds = array<i64: 16, 4>}, {pipeline_mode = #tpu.pipeline_mode<synchronous>, transform_indices = @transform_4, window_bounds = array<i64: 1, 4>}, {transform_indices = @transform_5, window_bounds = array<i64: 8, 128>}]} {
    %c0 = arith.constant 0 : index
    %c0_0 = arith.constant 0 : index
    %c0_1 = arith.constant 0 : index
    %0 = vector.load %arg1[%c0, %c0_0, %c0_1] : memref<8x16x128xf32, #tpu.memory_space<vmem>>, vector<8x16x128xf32>
    %1 = vector.shape_cast %0 : vector<8x16x128xf32> to vector<128x128xf32>
    %c0_2 = arith.constant 0 : index
    %c0_3 = arith.constant 0 : index
    %2 = vector.load %arg2[%c0_2, %c0_3] : memref<128x16xf32, #tpu.memory_space<vmem>>, vector<128x16xf32>
    %cst = arith.constant dense<0.000000e+00> : vector<128x16xf32>
    %3 = tpu.matmul %1, %2, %cst {dimension_numbers = #tpu.dot_dimension_numbers<[1], [0], [0], [1], [0, 0, 1, 1], [], []>} : vector<128x128xf32>, vector<128x16xf32>, vector<128x16xf32> -> vector<128x16xf32>
    %c0_4 = arith.constant 0 : index
    %c0_5 = arith.constant 0 : index
    %4 = vector.load %arg3[%c0_4, %c0_5] : memref<1x16xf32, #tpu.memory_space<vmem>>, vector<1x16xf32>
    %5 = vector.broadcast %4 : vector<1x16xf32> to vector<128x16xf32>
    %6 = arith.addf %3, %5 : vector<128x16xf32>
    %7 = math.tanh %6 : vector<128x16xf32>
    %c0_6 = arith.constant 0 : index
    %c0_7 = arith.constant 0 : index
    %8 = vector.load %arg4[%c0_6, %c0_7] : memref<16x4xf32, #tpu.memory_space<vmem>>, vector<16x4xf32>
    %cst_8 = arith.constant dense<0.000000e+00> : vector<128x4xf32>
    %9 = tpu.matmul %7, %8, %cst_8 {dimension_numbers = #tpu.dot_dimension_numbers<[1], [0], [0], [1], [0, 0, 1, 1], [], []>} : vector<128x16xf32>, vector<16x4xf32>, vector<128x4xf32> -> vector<128x4xf32>
    %c0_9 = arith.constant 0 : index
    %c0_10 = arith.constant 0 : index
    %10 = vector.load %arg5[%c0_9, %c0_10] : memref<1x4xf32, #tpu.memory_space<vmem>>, vector<1x4xf32>
    %11 = vector.broadcast %10 : vector<1x4xf32> to vector<128x4xf32>
    %12 = arith.addf %9, %11 : vector<128x4xf32>
    %13 = vector.shape_cast %12 : vector<128x4xf32> to vector<8x16x4xf32>
    %14 = tpu.iota {dimensions = array<i32: 1>} : vector<8x16x4xi32>
    %c12_i32 = arith.constant 12 : i32
    %15 = vector.broadcast %c12_i32 : i32 to vector<8x16x4xi32>
    %16 = arith.cmpi slt, %14, %15 : vector<8x16x4xi32>
    %cst_11 = arith.constant -1.000000e+30 : f32
    %17 = vector.broadcast %cst_11 : f32 to vector<8x16x4xf32>
    %18 = arith.select %16, %13, %17 : vector<8x16x4xi1>, vector<8x16x4xf32>
    %cst_12 = arith.constant dense<0xFF800000> : vector<8x4xf32>
    %19 = vector.multi_reduction <maximumf>, %18, %cst_12 [1] : vector<8x16x4xf32> to vector<8x4xf32>
    %20 = vector.shape_cast %19 : vector<8x4xf32> to vector<8x1x4xf32>
    %21 = vector.broadcast %20 : vector<8x1x4xf32> to vector<8x16x4xf32>
    %22 = arith.subf %18, %21 : vector<8x16x4xf32>
    %23 = math.exp %22 : vector<8x16x4xf32>
    %cst_13 = arith.constant dense<0.000000e+00> : vector<8x4xf32>
    %24 = vector.multi_reduction <add>, %23, %cst_13 [1] : vector<8x16x4xf32> to vector<8x4xf32>
    %25 = vector.shape_cast %24 : vector<8x4xf32> to vector<8x1x4xf32>
    %26 = tpu.reciprocal %25 {approx = true} : vector<8x1x4xf32> -> vector<8x1x4xf32>
    %27 = vector.broadcast %26 : vector<8x1x4xf32> to vector<8x16x4xf32>
    %28 = arith.mulf %23, %27 : vector<8x16x4xf32>
    %cst_14 = arith.constant dense<0.000000e+00> : vector<8x16xf32>
    %29 = vector.multi_reduction <add>, %28, %cst_14 [2] : vector<8x16x4xf32> to vector<8x16xf32>
    %30 = vector.shape_cast %29 : vector<8x16xf32> to vector<8x16x1xf32>
    %cst_15 = arith.constant 4.000000e+00 : f32
    %31 = vector.broadcast %cst_15 : f32 to vector<8x16x1xf32>
    %32 = arith.divf %30, %31 : vector<8x16x1xf32>
    %33 = vector.broadcast %32 : vector<8x16x1xf32> to vector<8x16x128xf32>
    %34 = arith.mulf %33, %0 : vector<8x16x128xf32>
    %cst_16 = arith.constant dense<0.000000e+00> : vector<8x128xf32>
    %35 = vector.multi_reduction <add>, %34, %cst_16 [1] : vector<8x16x128xf32> to vector<8x128xf32>
    %c0_17 = arith.constant 0 : index
    %c0_18 = arith.constant 0 : index
    %36 = vector.load %arg6[%c0_17, %c0_18] : memref<8x128xf32, #tpu.memory_space<vmem>>, vector<8x128xf32>
    tpu.vector_store %arg6[%c0_17, %c0_18], %35 {strides = array<i32>} : memref<8x128xf32, #tpu.memory_space<vmem>>, vector<8x128xf32>,
    return
  }
  func.func @transform_0(%arg0: i32) -> (i32, i32, i32) {
    %c0_i32 = arith.constant 0 : i32
    %c0_i32_0 = arith.constant 0 : i32
    %c0_i32_1 = arith.constant 0 : i32
    return %arg0, %c0_i32, %c0_i32_0 : i32, i32, i32
  }
  func.func @transform_1(%arg0: i32) -> (i32, i32) {
    %c0_i32 = arith.constant 0 : i32
    %c0_i32_0 = arith.constant 0 : i32
    %c0_i32_1 = arith.constant 0 : i32
    return %c0_i32, %c0_i32_0 : i32, i32
  }
  func.func @transform_2(%arg0: i32) -> (i32, i32) {
    %c0_i32 = arith.constant 0 : i32
    %c0_i32_0 = arith.constant 0 : i32
    %c0_i32_1 = arith.constant 0 : i32
    return %c0_i32, %c0_i32_0 : i32, i32
  }
  func.func @transform_3(%arg0: i32) -> (i32, i32) {
    %c0_i32 = arith.constant 0 : i32
    %c0_i32_0 = arith.constant 0 : i32
    %c0_i32_1 = arith.constant 0 : i32
    return %c0_i32, %c0_i32_0 : i32, i32
  }
  func.func @transform_4(%arg0: i32) -> (i32, i32) {
    %c0_i32 = arith.constant 0 : i32
    %c0_i32_0 = arith.constant 0 : i32
    %c0_i32_1 = arith.constant 0 : i32
    return %c0_i32, %c0_i32_0 : i32, i32
  }
  func.func @transform_5(%arg0: i32) -> (i32, i32) {
    %c0_i32 = arith.constant 0 : i32
    %c0_i32_0 = arith.constant 0 : i32
    return %arg0, %c0_i32 : i32, i32
  }
}

</mosaic_0001>

<bundles_post_ra>
// kernel: tpu_custom_call.1
= control target key start
LH: loop header
LB: loop body
LE: loop exit
PB: predicated region body
PF: predicated region fallthrough
CT: control target
= control target key end

     0   :  { %s1580_s0 = inlined_call_operand.vmem [shape: f32[8,16,128], index: 0, kind: input, shape index: {}]   ;;  %s1581_s1 = inlined_call_operand.vmem [shape: f32[128,16], index: 1, kind: input, shape index: {}]   ;;  %s1582_s2 = inlined_call_operand.vmem [shape: f32[1,16], index: 2, kind: input, shape index: {}]   ;;  %s1583_s3 = inlined_call_operand.vmem [shape: f32[16,4], index: 3, kind: input, shape index: {}]   ;;  %s1584_s4 = inlined_call_operand.vmem [shape: f32[1,4], index: 4, kind: input, shape index: {}]   ;;  %s1585_s5 = inlined_call_operand.hbm [shape: f32[8,128], index: 5, kind: output, shape index: {}]  }
   0x1   :  { %v37_v0 = vld [vmem:[%s1581_s1] sm:$0xff]  ;;  %v38_v1 = vld [vmem:[%s1581_s1 + $0x8] sm:$0xff]  ;;  %v39_v2 = vld [vmem:[%s1581_s1 + $0x10] sm:$0xff] }
   0x2   :  { %v989_v3 = vpack.c.bf16 %v38_v1, %v37_v0  ;;  %v40_v4 = vld [vmem:[%s1581_s1 + $0x18] sm:$0xff]  ;;  %v41_v6 = vld [vmem:[%s1581_s1 + $0x20] sm:$0xff]  ;;  %v42_v7 = vld [vmem:[%s1581_s1 + $0x28] sm:$0xff] }
   0x3   :  { %v993_v5 = vpack.c.bf16 %v40_v4, %v39_v2  ;;  %v997_v8 = vpack.c.bf16 %v42_v7, %v41_v6  ;;  %v1182_v9 = vld [vmem:[%s1580_s0] sm:$0xff]  ;;  %v43_v10 = vld [vmem:[%s1581_s1 + $0x30] sm:$0xff]  ;;  %v44_v11 = vld [vmem:[%s1581_s1 + $0x38] sm:$0xff] }
   0x4   :  { %990 = vmatprep.subr.bf16.mxu0 %v989_v3  ;;  %937 = vmatprep.mubr.f32.mxu0 %v1182_v9  ;;  %v1001_v12 = vpack.c.bf16 %v44_v11, %v43_v10  ;;  %v45_v13 = vld [vmem:[%s1581_s1 + $0x40] sm:$0xff]  ;;  %v46_v14 = vld [vmem:[%s1581_s1 + $0x48] sm:$0xff] }
   0x5   :  { %992 = vmatpush3.bf16.msra.mxu0 %v989_v3 }
   0x6   :  { %994 = vmatprep.subr.bf16.mxu0 %v993_v5 }
   0x9   :  { %996 = vmatpush3.bf16.msra.mxu0 %v993_v5 }
   0xa   :  { %998 = vmatprep.subr.bf16.mxu0 %v997_v8 }
   0xb   :  { %10 = vsyncpa [#allocation3], 0  ;;  %v1005_v15 = vpack.c.bf16 %v46_v14, %v45_v13  ;;  %v47_v16 = vld [vmem:[%s1581_s1 + $0x50] sm:$0xff]  ;;  %v48_v17 = vld [vmem:[%s1581_s1 + $0x58] sm:$0xff]  ;;  %vm230_vm0 = vcmask 130048   ;;  %vm445_vm2 = vcmask 31744  }
   0xc   :  { %v1009_v18 = vpack.c.bf16 %v48_v17, %v47_v16  ;;  %v49_v19 = vld [vmem:[%s1581_s1 + $0x60] sm:$0xff]  ;;  %v50_v20 = vld [vmem:[%s1581_s1 + $0x68] sm:$0xff]  ;;  %v51_v22 = vld [vmem:[%s1581_s1 + $0x70] sm:$0xff]  ;;  %vm807_vm3 = vcmask 1041409   ;;  %vm809_vm4 = vcmask 1042434   ;;  %vm811_vm5 = vcmask 1043459  }
   0xd   :  { %1000 = vmatpush3.bf16.msra.mxu0 %v997_v8  ;;  %v1013_v21 = vpack.c.bf16 %v50_v20, %v49_v19  ;;  %v52_v23 = vld [vmem:[%s1581_s1 + $0x78] sm:$0xff]  ;;  %v1218_v25 = vld [vmem:[%s1580_s0 + $0x8] sm:$0xff]  ;;  %v1223_v26 = vld [vmem:[%s1580_s0 + $0x10] sm:$0xff]  ;;  %vm813_vm6 = vcmask 1044484   ;;  %vm815_vm7 = vcmask 1045509   ;;  %vm817_vm8 = vcmask 1046534  }
   0xe   :  { %1002 = vmatprep.subr.bf16.mxu0 %v1001_v12  ;;  %v1017_v24 = vpack.c.bf16 %v52_v23, %v51_v22  ;;  %v1230_v27 = vld [vmem:[%s1580_s0 + $0x18] sm:$0xff]  ;;  %v1235_v28 = vld [vmem:[%s1580_s0 + $0x20] sm:$0xff]  ;;  %v1242_v29 = vld [vmem:[%s1580_s0 + $0x28] sm:$0xff]  ;;  %vm819_vm9 = vcmask 1047559  }
   0xf   :  { %v1247_v30 = vld [vmem:[%s1580_s0 + $0x30] sm:$0xff]  ;;  %v1254_v31 = vld [vmem:[%s1580_s0 + $0x38] sm:$0xff]  ;;  %v1259_v32 = vld [vmem:[%s1580_s0 + $0x40] sm:$0xff] }
  0x10   :  { %v1266_v33 = vld [vmem:[%s1580_s0 + $0x48] sm:$0xff]  ;;  %v1271_v34 = vld [vmem:[%s1580_s0 + $0x50] sm:$0xff]  ;;  %v1278_v35 = vld [vmem:[%s1580_s0 + $0x58] sm:$0xff] }
  0x11   :  { %1004 = vmatpush3.bf16.msra.mxu0 %v1001_v12  ;;  %v1283_v36 = vld [vmem:[%s1580_s0 + $0x60] sm:$0xff]  ;;  %v1290_v37 = vld [vmem:[%s1580_s0 + $0x68] sm:$0xff]  ;;  %v1295_v38 = vld [vmem:[%s1580_s0 + $0x70] sm:$0xff] }
  0x12   :  { %1006 = vmatprep.subr.bf16.mxu0 %v1005_v15  ;;  %v1302_v39 = vld [vmem:[%s1580_s0 + $0x78] sm:$0xff]  ;;  %v221_v40 = vld [vmem:[%s1583_s3] sm:$0xff]  ;;  %v222_v41 = vld [vmem:[%s1583_s3 + $0x8] sm:$0xff]  ;;  %s1130_s3 = smov [#allocation2]  }
  0x13   :  { %v1021_v42 = vpack.c.bf16 %v222_v41, %v221_v40  ;;  %v1314_v43 = vld [vmem:[%s1582_s2] ss:$0 sm:$0xff] }
  0x15   :  { %1008 = vmatpush3.bf16.msra.mxu0 %v1005_v15  ;;  %1022 = vmatprep.subr.bf16.mxu1 %v1021_v42 }
  0x16   :  { %1010 = vmatprep.subr.bf16.mxu0 %v1009_v18  ;;  %1024 = vmatpush3.bf16.msra.mxu1 %v1021_v42 }
  0x19   :  { %1012 = vmatpush3.bf16.msra.mxu0 %v1009_v18 }
  0x1a   :  { %1014 = vmatprep.subr.bf16.mxu0 %v1013_v21 }
  0x1d   :  { %1016 = vmatpush3.bf16.msra.mxu0 %v1013_v21 }
  0x1e   :  { %1018 = vmatprep.subr.bf16.mxu0 %v1017_v24 }
  0x21   :  { %1020 = vmatpush3.bf16.msra.mxu0 %v1017_v24 }
  0x24   :  { %938 = vmatmul.mubr.f32.vlgmr.msra.gmra.mrb[0].mxu0 %v1218_v25 }
  0x25   :  { %940 = vmatprep.mubr.f32.mxu0 %v1223_v26 }
  0x28   :  { %941 = vmatmul.mubr.f32.gmra.mrb[2].mxu0 %v1230_v27 }
  0x29   :  { %943 = vmatprep.mubr.f32.mxu0 %v1235_v28 }
  0x2c   :  { %944 = vmatmul.mubr.f32.gmra.mrb[4].mxu0 %v1242_v29 }
  0x2d   :  { %946 = vmatprep.mubr.f32.mxu0 %v1247_v30 }
  0x30   :  { %947 = vmatmul.mubr.f32.gmra.mrb[6].mxu0 %v1254_v31 }
  0x31   :  { %949 = vmatprep.mubr.f32.mxu0 %v1259_v32 }
  0x34   :  { %950 = vmatmul.mubr.f32.gmra.mrb[8].mxu0 %v1266_v33 }
  0x35   :  { %952 = vmatprep.mubr.f32.mxu0 %v1271_v34 }
  0x38   :  { %953 = vmatmul.mubr.f32.gmra.mrb[10].mxu0 %v1278_v35 }
  0x39   :  { %955 = vmatprep.mubr.f32.mxu0 %v1283_v36 }
  0x3c   :  { %956 = vmatmul.mubr.f32.gmra.mrb[12].mxu0 %v1290_v37 }
  0x3d   :  { %958 = vmatprep.mubr.f32.mxu0 %v1295_v38 }
  0x40   :  { %959 = vmatmul.mubr.f32.gmra.mrb[14].mxu0 %v1302_v39 }
  0xf7   :  { %v939_v44 = vpop.f32.mrb[0].mxu0 }
  0xf8   :  { %v132_v45 = vadd.f32 %v939_v44, %v1314_v43  ;;  %v126_v46 = vpop.f32.mrb[1].mxu0  ;;  %v424_v44 = vlaneseq }
  0xf9   :  { %v127_v47 = vadd.f32 %v1314_v43, %v126_v46 }
  0xfb   :  { %1026 = vtanh.f32 %v127_v47  ;;  %v942_v48 = vpop.f32.mrb[2].mxu0  ;;  %v1353_v47 = vld [vmem:[%s1584_s4] ss:$0 sm:$0xff]  ;;  %s829_s4 = sshll.u32 %s1130_s3, 4  ;;  %s830_s4 = int_to_ptr.vmem [resolvable:$true] %s829_s4 }
  0xfc   :  { %1028 = vtanh.f32 %v132_v45  ;;  %v142_v49 = vadd.f32 %v942_v48, %v1314_v43  ;;  %v136_v50 = vpop.f32.mrb[3].mxu0  ;;  %v425_v45 = vshrl.u32 %v424_v44, 7  ;;  %s1106_s11 = scalar_lea.vmem %s830_s4, 128  ;;  %p1111_p1 = scmp.lt.s32.totalorder %s830_s4, %s830_s4 }
  0xfd   :  { %v137_v51 = vadd.f32 %v1314_v43, %v136_v50  ;;  %p1107_p0 = scmp.ne.s32.totalorder %s830_s4, %s1106_s11  ;;  %p1112_p2 = scmp.lt.s32.totalorder %s1106_s11, %s1106_s11 }
  0xfe   :  { %v1348_v46 = vadd.s32 8, %v425_v45 }
  0xff   :  { %1030 = vtanh.f32 %v137_v51  ;;  %v945_v52 = vpop.f32.mrb[4].mxu0  ;;  %p1113_p3 = por %p1112_p2, %p1111_p1 }
 0x100   :  { %1032 = vtanh.f32 %v142_v49  ;;  %v152_v53 = vadd.f32 %v945_v52, %v1314_v43  ;;  %v146_v54 = vpop.f32.mrb[5].mxu0  ;;  %vm428_vm1 = vcmp.lt.s32.totalorder %v1348_v46, 12 }
 0x101   :  { %v147_v55 = vadd.f32 %v1314_v43, %v146_v54  ;;  %p1114_p4 = pnand %p1113_p3, %p1107_p0 }
 0x102   :  { %1034 = vtanh.f32 %v152_v53 }
 0x103   :  { %1036 = vtanh.f32 %v147_v55  ;;  %v948_v56 = vpop.f32.mrb[6].mxu0 }
 0x104   :  { %v162_v57 = vadd.f32 %v948_v56, %v1314_v43  ;;  %v156_v58 = vpop.f32.mrb[7].mxu0 }
 0x105   :  { %v1027_v59 = vpop.eup %1026  ;;  %v157_v60 = vadd.f32 %v1314_v43, %v156_v58 }
 0x106   :  { %v1029_v61 = vpop.eup %1028  ;;  %1038 = vtanh.f32 %v162_v57  ;;  %965 = vmatprep.mubr.msk.f32.mxu1 %vm230_vm0, %v1027_v59 }
 0x107   :  { %1040 = vtanh.f32 %v157_v60  ;;  %v951_v62 = vpop.f32.mrb[8].mxu0  ;;  %966 = vmatmul.mubr.msk.f32.vlgmr.msra.gmra.mrb[0].mxu1 %vm230_vm0, %v1029_v61 }
 0x108   :  { %v172_v63 = vadd.f32 %v951_v62, %v1314_v43  ;;  %v166_v0 = vpop.f32.mrb[9].mxu0 }
 0x109   :  { %v1031_v1 = vpop.eup %1030  ;;  %v167_v2 = vadd.f32 %v1314_v43, %v166_v0 }
 0x10a   :  { %v1033_v3 = vpop.eup %1032  ;;  %1042 = vtanh.f32 %v172_v63  ;;  %968 = vmatprep.mubr.msk.f32.mxu1 %vm230_vm0, %v1031_v1 }
 0x10b   :  { %1044 = vtanh.f32 %v167_v2  ;;  %v954_v4 = vpop.f32.mrb[10].mxu0  ;;  %969 = vmatmul.mubr.msk.f32.gmra.mrb[2].mxu1 %vm230_vm0, %v1033_v3 }
 0x10c   :  { %v1035_v5 = vpop.eup %1034  ;;  %v182_v6 = vadd.f32 %v954_v4, %v1314_v43  ;;  %v176_v7 = vpop.f32.mrb[11].mxu0 }
 0x10d   :  { %v1037_v8 = vpop.eup %1036  ;;  %v177_v10 = vadd.f32 %v1314_v43, %v176_v7 }
 0x10e   :  { %1046 = vtanh.f32 %v182_v6  ;;  %971 = vmatprep.mubr.msk.f32.mxu1 %vm230_vm0, %v1037_v8 }
 0x10f   :  { %1048 = vtanh.f32 %v177_v10  ;;  %v957_v11 = vpop.f32.mrb[12].mxu0  ;;  %972 = vmatmul.mubr.msk.f32.gmra.mrb[4].mxu1 %vm230_vm0, %v1035_v5 }
 0x110   :  { %v1039_v12 = vpop.eup %1038  ;;  %v192_v13 = vadd.f32 %v957_v11, %v1314_v43  ;;  %v186_v14 = vpop.f32.mrb[13].mxu0 }
 0x111   :  { %v1041_v15 = vpop.eup %1040  ;;  %v187_v16 = vadd.f32 %v1314_v43, %v186_v14 }
 0x112   :  { %1050 = vtanh.f32 %v192_v13  ;;  %974 = vmatprep.mubr.msk.f32.mxu1 %vm230_vm0, %v1041_v15 }
 0x113   :  { %1052 = vtanh.f32 %v187_v16  ;;  %v960_v17 = vpop.f32.mrb[14].mxu0  ;;  %975 = vmatmul.mubr.msk.f32.gmra.mrb[6].mxu1 %vm230_vm0, %v1039_v12 }
 0x114   :  { %v1043_v18 = vpop.eup %1042  ;;  %v202_v19 = vadd.f32 %v960_v17, %v1314_v43  ;;  %v196_v20 = vpop.f32.mrb[15].mxu0 }
 0x115   :  { %v1045_v21 = vpop.eup %1044  ;;  %v197_v22 = vadd.f32 %v1314_v43, %v196_v20 }
 0x116   :  { %1054 = vtanh.f32 %v202_v19  ;;  %977 = vmatprep.mubr.msk.f32.mxu1 %vm230_vm0, %v1045_v21 }
 0x117   :  { %1056 = vtanh.f32 %v197_v22  ;;  %978 = vmatmul.mubr.msk.f32.gmra.mrb[8].mxu1 %vm230_vm0, %v1043_v18 }
 0x118   :  { %v1047_v23 = vpop.eup %1046 }
 0x119   :  { %v1049_v24 = vpop.eup %1048 }
 0x11a   :  { %980 = vmatprep.mubr.msk.f32.mxu1 %vm230_vm0, %v1049_v24 }
 0x11b   :  { %981 = vmatmul.mubr.msk.f32.gmra.mrb[10].mxu1 %vm230_vm0, %v1047_v23 }
 0x11c   :  { %v1051_v40 = vpop.eup %1050 }
 0x11d   :  { %v1053_v41 = vpop.eup %1052 }
 0x11e   :  { %983 = vmatprep.mubr.msk.f32.mxu1 %vm230_vm0, %v1053_v41 }
 0x11f   :  { %984 = vmatmul.mubr.msk.f32.gmra.mrb[12].mxu1 %vm230_vm0, %v1051_v40 }
 0x120   :  { %v1055_v42 = vpop.eup %1054 }
 0x121   :  { %v1057_v43 = vpop.eup %1056 }
 0x122   :  { %986 = vmatprep.mubr.msk.f32.mxu1 %vm230_vm0, %v1057_v43 }
 0x123   :  { %987 = vmatmul.mubr.msk.f32.gmra.mrb[14].mxu1 %vm230_vm0, %v1055_v42 }
 0x1da   :  { %v967_v48 = vpop.f32.mrb[0].mxu1 }
 0x1db   :  { %v351_v49 = vadd.f32 %v967_v48, %v1353_v47  ;;  %v345_v50 = vpop.f32.mrb[1].mxu1 }
 0x1dc   :  { %v346_v51 = vadd.f32 %v1353_v47, %v345_v50 }
 0x1dd   :  { %v430_v52 = vsel %vm428_vm1, %v351_v49, -1e+30 }
 0x1de   :  { %v447_v53 = vsel %vm445_vm2, %v430_v52, -inf  ;;  %v446_v54 = vsel %vm445_vm2, %v346_v51, -inf  ;;  %v970_v55 = vpop.f32.mrb[2].mxu1 }
 0x1df   :  { %v448_v56 = vmax.f32 %v446_v54, %v447_v53  ;;  %v361_v57 = vadd.f32 %v970_v55, %v1353_v47  ;;  %v355_v58 = vpop.f32.mrb[3].mxu1 }
 0x1e0   :  { %v1364_v59 = vadd.f32 %v1353_v47, %v355_v58 }
 0x1e1   :  { %v449_v60 = vrot.slane %v448_v56, 4  ;;  %v432_v61 = vsel %vm428_vm1, %v361_v57, -1e+30 }
 0x1e2   :  { %v456_v62 = vsel %vm445_vm2, %v432_v61, -inf  ;;  %v455_v63 = vsel %vm445_vm2, %v1364_v59, -inf  ;;  %v973_v0 = vpop.f32.mrb[4].mxu1 }
 0x1e3   :  { %v450_v1 = vmax.f32 %v448_v56, %v449_v60  ;;  %v457_v2 = vmax.f32 %v455_v63, %v456_v62  ;;  %v371_v3 = vadd.f32 %v973_v0, %v1353_v47  ;;  %v365_v4 = vpop.f32.mrb[5].mxu1 }
 0x1e4   :  { %v1373_v5 = vadd.f32 %v1353_v47, %v365_v4 }
 0x1e5   :  { %v451_v6 = vrot.slane %v450_v1, 2  ;;  %v458_v7 = vrot.slane %v457_v2, 4  ;;  %v1377_v8 = vsel %vm428_vm1, %v371_v3, -1e+30 }
 0x1e6   :  { %v465_v10 = vsel %vm445_vm2, %v1377_v8, -inf  ;;  %v464_v11 = vsel %vm445_vm2, %v1373_v5, -inf  ;;  %v976_v12 = vpop.f32.mrb[6].mxu1 }
 0x1e7   :  { %v452_v13 = vmax.f32 %v450_v1, %v451_v6  ;;  %v459_v14 = vmax.f32 %v457_v2, %v458_v7  ;;  %v466_v15 = vmax.f32 %v464_v11, %v465_v10  ;;  %v381_v16 = vadd.f32 %v976_v12, %v1353_v47  ;;  %v375_v17 = vpop.f32.mrb[7].mxu1 }
 0x1e8   :  { %v1385_v18 = vadd.f32 %v1353_v47, %v375_v17 }
 0x1e9   :  { %v453_v19 = vrot.slane %v452_v13, 1  ;;  %v460_v20 = vrot.slane %v459_v14, 2  ;;  %v467_v21 = vrot.slane %v466_v15, 4  ;;  %v1389_v22 = vsel %vm428_vm1, %v381_v16, -1e+30 }
 0x1ea   :  { %v474_v23 = vsel %vm445_vm2, %v1389_v22, -inf  ;;  %v473_v24 = vsel %vm445_vm2, %v1385_v18, -inf  ;;  %v979_v40 = vpop.f32.mrb[8].mxu1 }
 0x1eb   :  { %v454_v41 = vmax.f32 %v452_v13, %v453_v19  ;;  %v461_v42 = vmax.f32 %v459_v14, %v460_v20  ;;  %v468_v43 = vmax.f32 %v466_v15, %v467_v21  ;;  %v475_v44 = vmax.f32 %v473_v24, %v474_v23  ;;  %v385_v45 = vpop.f32.mrb[9].mxu1 }
 0x1ec   :  { %v391_v48 = vadd.f32 %v979_v40, %v1353_v47  ;;  %v1397_v49 = vadd.f32 %v1353_v47, %v385_v45 }
 0x1ed   :  { %v518_v50 = vsub.f32 %v346_v51, %v454_v41  ;;  %v519_v53 = vsub.f32 %v430_v52, %v454_v41  ;;  %v462_v54 = vrot.slane %v461_v42, 1  ;;  %v469_v55 = vrot.slane %v468_v43, 2 }
 0x1ee   :  { %v476_v56 = vrot.slane %v475_v44, 4  ;;  %v1401_v57 = vsel %vm428_vm1, %v391_v48, -1e+30  ;;  %v482_v58 = vsel %vm445_vm2, %v1397_v49, -inf  ;;  %v982_v60 = vpop.f32.mrb[10].mxu1 }
 0x1ef   :  { %v534_v62 = vmul.f32 1.442695, %v518_v50  ;;  %v536_v63 = vmul.f32 1.442695, %v519_v53  ;;  %v463_v0 = vmax.f32 %v461_v42, %v462_v54  ;;  %v470_v1 = vmax.f32 %v468_v43, %v469_v55  ;;  %v395_v2 = vpop.f32.mrb[11].mxu1 }
 0x1f0   :  { %v477_v3 = vmax.f32 %v475_v44, %v476_v56  ;;  %v483_v51 = vsel %vm445_vm2, %v1401_v57, -inf  ;;  %v401_v52 = vadd.f32 %v982_v60, %v1353_v47  ;;  %v1409_v4 = vadd.f32 %v1353_v47, %v395_v2 }
 0x1f1   :  { %1058 = vpow2.f32 %v534_v62  ;;  %v520_v6 = vsub.f32 %v1364_v59, %v463_v0  ;;  %v521_v7 = vsub.f32 %v432_v61, %v463_v0  ;;  %v471_v10 = vrot.slane %v470_v1, 1 }
 0x1f2   :  { %1060 = vpow2.f32 %v536_v63  ;;  %v478_v11 = vrot.slane %v477_v3, 2  ;;  %v484_v12 = vmax.f32 %v482_v58, %v483_v51  ;;  %v1414_v13 = vsel %vm428_vm1, %v401_v52, -1e+30  ;;  %v985_v14 = vpop.f32.mrb[12].mxu1 }
 0x1f3   :  { %v538_v15 = vmul.f32 1.442695, %v520_v6  ;;  %v540_v16 = vmul.f32 1.442695, %v521_v7  ;;  %v472_v17 = vmax.f32 %v470_v1, %v471_v10  ;;  %v492_v19 = vsel %vm445_vm2, %v1414_v13, -inf  ;;  %v405_v20 = vpop.f32.mrb[13].mxu1 }
 0x1f4   :  { %v479_v21 = vmax.f32 %v477_v3, %v478_v11  ;;  %v485_v23 = vrot.slane %v484_v12, 4  ;;  %v491_v59 = vsel %vm445_vm2, %v1409_v4, -inf  ;;  %v411_v61 = vadd.f32 %v985_v14, %v1353_v47 }
 0x1f5   :  { %1062 = vpow2.f32 %v538_v15  ;;  %v522_v24 = vsub.f32 %v1373_v5, %v472_v17  ;;  %v523_v40 = vsub.f32 %v1377_v8, %v472_v17  ;;  %v493_v41 = vmax.f32 %v491_v59, %v492_v19 }
 0x1f6   :  { %1064 = vpow2.f32 %v540_v16  ;;  %v480_v42 = vrot.slane %v479_v21, 1  ;;  %v486_v43 = vmax.f32 %v484_v12, %v485_v23  ;;  %v1425_v44 = vsel %vm428_vm1, %v411_v61, -1e+30  ;;  %v988_v45 = vpop.f32.mrb[14].mxu1 }
 0x1f7   :  { %v542_v48 = vmul.f32 1.442695, %v522_v24  ;;  %v544_v50 = vmul.f32 1.442695, %v523_v40  ;;  %v494_v53 = vrot.slane %v493_v41, 4  ;;  %v1428_v56 = vadd.f32 %v1353_v47, %v405_v20  ;;  %v415_v8 = vpop.f32.mrb[15].mxu1 }
 0x1f8   :  { %v481_v54 = vmax.f32 %v479_v21, %v480_v42  ;;  %v487_v55 = vrot.slane %v486_v43, 2  ;;  %v421_v5 = vadd.f32 %v988_v45, %v1353_v47  ;;  %v501_v60 = vsel %vm445_vm2, %v1425_v44, -inf }
 0x1f9   :  { %1066 = vpow2.f32 %v542_v48  ;;  %v495_v58 = vmax.f32 %v493_v41, %v494_v53  ;;  %v1434_v62 = vadd.f32 %v1353_v47, %v415_v8  ;;  %v500_v51 = vsel %vm445_vm2, %v1428_v56, -inf }
 0x1fa   :  { %1068 = vpow2.f32 %v544_v50  ;;  %v524_v63 = vsub.f32 %v1385_v18, %v481_v54  ;;  %v525_v0 = vsub.f32 %v1389_v22, %v481_v54  ;;  %v488_v1 = vmax.f32 %v486_v43, %v487_v55 }
 0x1fb   :  { %v1438_v2 = vpop.eup %1058  ;;  %v496_v3 = vrot.slane %v495_v58, 2  ;;  %v1444_v52 = vsel %vm428_vm1, %v421_v5, -1e+30  ;;  %v509_v47 = vsel %vm445_vm2, %v1434_v62, -inf  ;;  %v502_v14 = vmax.f32 %v500_v51, %v501_v60 }
 0x1fc   :  { %v1448_v6 = vpop.eup %1060  ;;  %v566_v18 = vsel %vm445_vm2, %v1438_v2, 0.0  ;;  %v546_v22 = vmul.f32 1.442695, %v524_v63  ;;  %v548_v7 = vmul.f32 1.442695, %v525_v0  ;;  %v489_v10 = vrot.slane %v488_v1, 1 }
 0x1fd   :  { %v567_v11 = vsel %vm445_vm2, %v1448_v6, 0.0  ;;  %v497_v12 = vmax.f32 %v495_v58, %v496_v3  ;;  %v510_v46 = vsel %vm445_vm2, %v1444_v52, -inf  ;;  %v503_v21 = vrot.slane %v502_v14, 4 }
 0x1fe   :  { %v568_v15 = vadd.f32 %v567_v11, %v566_v18  ;;  %1070 = vpow2.f32 %v546_v22  ;;  %v490_v16 = vmax.f32 %v488_v1, %v489_v10  ;;  %v511_v17 = vmax.f32 %v509_v47, %v510_v46 }
 0x1ff   :  { %v1456_v19 = vpop.eup %1062  ;;  %1072 = vpow2.f32 %v548_v7  ;;  %v498_v20 = vrot.slane %v497_v12, 1  ;;  %v504_v43 = vmax.f32 %v502_v14, %v503_v21 }
 0x200   :  { %v1458_v23 = vpop.eup %1064  ;;  %v569_v59 = vrot.slane %v568_v15, 4  ;;  %v575_v61 = vsel %vm445_vm2, %v1456_v19, 0.0  ;;  %v526_v24 = vsub.f32 %v1397_v49, %v490_v16  ;;  %v527_v40 = vsub.f32 %v1401_v57, %v490_v16 }
 0x201   :  { %v576_v41 = vsel %vm445_vm2, %v1458_v23, 0.0  ;;  %v499_v42 = vmax.f32 %v497_v12, %v498_v20  ;;  %v512_v45 = vrot.slane %v511_v17, 4  ;;  %v505_v58 = vrot.slane %v504_v43, 2 }
 0x202   :  { %v577_v48 = vadd.f32 %v576_v41, %v575_v61  ;;  %v550_v50 = vmul.f32 1.442695, %v526_v24  ;;  %v552_v53 = vmul.f32 1.442695, %v527_v40  ;;  %v570_v54 = vadd.f32 %v569_v59, %v568_v15 }
 0x203   :  { %v1466_v55 = vpop.eup %1066  ;;  %v528_v5 = vsub.f32 %v1409_v4, %v499_v42  ;;  %v529_v8 = vsub.f32 %v1414_v13, %v499_v42  ;;  %v513_v49 = vmax.f32 %v511_v17, %v512_v45  ;;  %v506_v4 = vmax.f32 %v504_v43, %v505_v58 }
 0x204   :  { %v1470_v60 = vpop.eup %1068  ;;  %v578_v57 = vrot.slane %v577_v48, 4  ;;  %v584_v63 = vsel %vm445_vm2, %v1466_v55, 0.0  ;;  %1074 = vpow2.f32 %v550_v50  ;;  %v571_v0 = vrot.slane %v570_v54, 2 }
 0x205   :  { %v585_v1 = vsel %vm445_vm2, %v1470_v60, 0.0  ;;  %1076 = vpow2.f32 %v552_v53  ;;  %v554_v3 = vmul.f32 1.442695, %v528_v5  ;;  %v556_v51 = vmul.f32 1.442695, %v529_v8 }
 0x206   :  { %v586_v47 = vadd.f32 %v585_v1, %v584_v63  ;;  %v514_v18 = vrot.slane %v513_v49, 2  ;;  %v572_v13 = vadd.f32 %v571_v0, %v570_v54  ;;  %v579_v22 = vadd.f32 %v578_v57, %v577_v48 }
 0x207   :  { %1078 = vpow2.f32 %v554_v3  ;;  %v507_v11 = vrot.slane %v506_v4, 1 }
 0x208   :  { %v1476_v7 = vpop.eup %1070  ;;  %v587_v10 = vrot.slane %v586_v47, 4  ;;  %1080 = vpow2.f32 %v556_v51  ;;  %v515_v12 = vmax.f32 %v513_v49, %v514_v18  ;;  %v573_v15 = vrot.slane %v572_v13, 1 }
 0x209   :  { %v1478_v14 = vpop.eup %1072  ;;  %v593_v46 = vsel %vm445_vm2, %v1476_v7, 0.0  ;;  %v580_v16 = vrot.slane %v579_v22, 2  ;;  %v508_v21 = vmax.f32 %v506_v4, %v507_v11 }
 0x20a   :  { %v588_v17 = vadd.f32 %v587_v10, %v586_v47  ;;  %v594_v20 = vsel %vm445_vm2, %v1478_v14, 0.0  ;;  %v516_v59 = vrot.slane %v515_v12, 1  ;;  %v574_v24 = vadd.f32 %v573_v15, %v572_v13 }
 0x20b   :  { %v595_v61 = vadd.f32 %v594_v20, %v593_v46  ;;  %v581_v40 = vadd.f32 %v580_v16, %v579_v22  ;;  %v530_v41 = vsub.f32 %v1428_v56, %v508_v21  ;;  %v531_v42 = vsub.f32 %v1425_v44, %v508_v21 }
 0x20c   :  { %v517_v43 = vmax.f32 %v515_v12, %v516_v59  ;;  %v589_v45 = vrot.slane %v588_v17, 2  ;;  %1082 = vrcp.f32 %v574_v24 }
 0x20d   :  { %v596_v48 = vrot.slane %v595_v61, 4  ;;  %v582_v50 = vrot.slane %v581_v40, 1  ;;  %v558_v54 = vmul.f32 1.442695, %v530_v41  ;;  %v560_v5 = vmul.f32 1.442695, %v531_v42 }
 0x20e   :  { %v1486_v53 = vpop.eup %1074  ;;  %v532_v8 = vsub.f32 %v1434_v62, %v517_v43  ;;  %v533_v58 = vsub.f32 %v1444_v52, %v517_v43  ;;  %v590_v63 = vadd.f32 %v589_v45, %v588_v17 }
 0x20f   :  { %v1490_v49 = vpop.eup %1076  ;;  %v597_v57 = vadd.f32 %v596_v48, %v595_v61  ;;  %v602_v56 = vsel %vm445_vm2, %v1486_v53, 0.0  ;;  %v583_v44 = vadd.f32 %v582_v50, %v581_v40  ;;  %1084 = vpow2.f32 %v558_v54 }
 0x210   :  { %v603_v0 = vsel %vm445_vm2, %v1490_v49, 0.0  ;;  %v562_v1 = vmul.f32 1.442695, %v532_v8  ;;  %v564_v3 = vmul.f32 1.442695, %v533_v58  ;;  %1086 = vpow2.f32 %v560_v5 }
 0x211   :  { %v1496_v51 = vpop.eup %1078  ;;  %v604_v47 = vadd.f32 %v603_v0, %v602_v56  ;;  %v591_v62 = vrot.slane %v590_v63, 1  ;;  %v598_v52 = vrot.slane %v597_v57, 2 }
 0x212   :  { %v1498_v4 = vpop.eup %1080  ;;  %v611_v18 = vsel %vm445_vm2, %v1496_v51, 0.0  ;;  %1088 = vpow2.f32 %v562_v1 }
 0x213   :  { %v605_v13 = vrot.slane %v604_v47, 4  ;;  %v612_v22 = vsel %vm445_vm2, %v1498_v4, 0.0  ;;  %1090 = vpow2.f32 %v564_v3  ;;  %v592_v10 = vadd.f32 %v591_v62, %v590_v63 }
 0x214   :  { %v613_v11 = vadd.f32 %v612_v22, %v611_v18  ;;  %1092 = vrcp.f32 %v583_v44  ;;  %v599_v12 = vadd.f32 %v598_v52, %v597_v57 }
 0x215   :  { %v606_v46 = vadd.f32 %v605_v13, %v604_v47  ;;  %1094 = vrcp.f32 %v592_v10 }
 0x216   :  { %v614_v15 = vrot.slane %v613_v11, 4  ;;  %v600_v16 = vrot.slane %v599_v12, 1  ;;  %v1083_v17 = vpop.eup %1082 }
 0x217   :  { %v607_v20 = vrot.slane %v606_v46, 2  ;;  %v646_v59 = vmul.f32 %v1083_v17, %v1438_v2  ;;  %v647_v61 = vmul.f32 %v1083_v17, %v1448_v6 }
 0x218   :  { %v615_v21 = vadd.f32 %v614_v15, %v613_v11  ;;  %v601_v24 = vadd.f32 %v600_v16, %v599_v12 }
 0x219   :  { %v608_v40 = vadd.f32 %v607_v20, %v606_v46  ;;  %v1506_v41 = vpop.eup %1084  ;;  %v662_v42 = vsel %vm445_vm2, %v646_v59, 0.0  ;;  %v665_v63 = vsel %vm445_vm2, %v647_v61, 0.0 }
 0x21a   :  { %1096 = vrcp.f32 %v601_v24  ;;  %v616_v43 = vrot.slane %v615_v21, 2  ;;  %v1509_v45 = vpop.eup %1086  ;;  %v620_v48 = vsel %vm445_vm2, %v1506_v41, 0.0  ;;  %663 = vadd.xlane.f32.xlu0 %v662_v42 }
 0x21b   :  { %v609_v50 = vrot.slane %v608_v40, 1  ;;  %v621_v2 = vsel %vm445_vm2, %v1509_v45, 0.0 }
 0x21c   :  { %v1513_v54 = vpop.eup %1088  ;;  %v617_v6 = vadd.f32 %v616_v43, %v615_v21  ;;  %v622_v8 = vadd.f32 %v621_v2, %v620_v48 }
 0x21d   :  { %v1517_v5 = vpop.eup %1090  ;;  %v629_v58 = vsel %vm445_vm2, %v1513_v54, 0.0  ;;  %v610_v57 = vadd.f32 %v609_v50, %v608_v40 }
 0x21e   :  { %v1093_v56 = vpop.eup %1092  ;;  %v630_v44 = vsel %vm445_vm2, %v1517_v5, 0.0  ;;  %v618_v0 = vrot.slane %v617_v6, 1  ;;  %v623_v3 = vrot.slane %v622_v8, 4  ;;  %666 = vadd.xlane.f32.xlu0 %v665_v63 }
 0x21f   :  { %v1095_v1 = vpop.eup %1094  ;;  %v631_v47 = vadd.f32 %v630_v44, %v629_v58  ;;  %v648_v62 = vmul.f32 %v1093_v56, %v1456_v19  ;;  %v649_v52 = vmul.f32 %v1093_v56, %v1458_v23  ;;  %1098 = vrcp.f32 %v610_v57 }
 0x220   :  { %v650_v18 = vmul.f32 %v1095_v1, %v1466_v55  ;;  %v651_v13 = vmul.f32 %v1095_v1, %v1470_v60  ;;  %v619_v22 = vadd.f32 %v618_v0, %v617_v6  ;;  %v624_v10 = vadd.f32 %v623_v3, %v622_v8 }
 0x221   :  { %v632_v11 = vrot.slane %v631_v47, 4  ;;  %v668_v12 = vsel %vm445_vm2, %v648_v62, 0.0  ;;  %v671_v23 = vsel %vm445_vm2, %v649_v52, 0.0 }
 0x222   :  { %669 = vadd.xlane.f32.xlu1 %v668_v12  ;;  %v674_v46 = vsel %vm445_vm2, %v650_v18, 0.0  ;;  %1100 = vrcp.f32 %v619_v22  ;;  %v625_v19 = vrot.slane %v624_v10, 2  ;;  %v677_v24 = vsel %vm445_vm2, %v651_v13, 0.0 }
 0x223   :  { %v633_v15 = vadd.f32 %v632_v11, %v631_v47  ;;  %675 = vadd.xlane.f32.xlu0 %v674_v46 }
 0x224   :  { %v1097_v16 = vpop.eup %1096  ;;  %v626_v17 = vadd.f32 %v625_v19, %v624_v10 }
 0x225   :  { %v652_v55 = vmul.f32 %v1097_v16, %v1476_v7  ;;  %v653_v60 = vmul.f32 %v1097_v16, %v1478_v14  ;;  %v634_v20 = vrot.slane %v633_v15, 2 }
 0x226   :  { %672 = vadd.xlane.f32.xlu1 %v671_v23  ;;  %v627_v59 = vrot.slane %v626_v17, 1 }
 0x227   :  { %v680_v21 = vsel %vm445_vm2, %v652_v55, 0.0  ;;  %v635_v61 = vadd.f32 %v634_v20, %v633_v15  ;;  %v683_v2 = vsel %vm445_vm2, %v653_v60, 0.0 }
 0x228   :  { %681 = vadd.xlane.f32.xlu0 %v680_v21  ;;  %v628_v40 = vadd.f32 %v627_v59, %v626_v17 }
 0x229   :  { %v636_v42 = vrot.slane %v635_v61, 1  ;;  %v1099_v43 = vpop.eup %1098 }
 0x22a   :  { %678 = vadd.xlane.f32.xlu1 %v677_v24  ;;  %v654_v48 = vmul.f32 %v1099_v43, %v1486_v53  ;;  %v655_v7 = vmul.f32 %v1099_v43, %v1490_v49  ;;  %1102 = vrcp.f32 %v628_v40 }
 0x22b   :  { %v637_v14 = vadd.f32 %v636_v42, %v635_v61 }
 0x22c   :  { %v1101_v50 = vpop.eup %1100  ;;  %v686_v6 = vsel %vm445_vm2, %v654_v48, 0.0  ;;  %v689_v53 = vsel %vm445_vm2, %v655_v7, 0.0 }
 0x22d   :  { %v656_v8 = vmul.f32 %v1101_v50, %v1496_v51  ;;  %v657_v58 = vmul.f32 %v1101_v50, %v1498_v4  ;;  %687 = vadd.xlane.f32.xlu0 %v686_v6  ;;  %1104 = vrcp.f32 %v637_v14 }
 0x22e   :  { %684 = vadd.xlane.f32.xlu1 %v683_v2 }
 0x22f   :  { %v692_v57 = vsel %vm445_vm2, %v656_v8, 0.0  ;;  %v695_v56 = vsel %vm445_vm2, %v657_v58, 0.0 }
 0x231   :  { %693 = vadd.xlane.f32.xlu0 %v692_v57 }
 0x232   :  { %690 = vadd.xlane.f32.xlu1 %v689_v53 }
 0x234   :  { %v1103_v49 = vpop.eup %1102 }
 0x235   :  { %v658_v44 = vmul.f32 %v1103_v49, %v1506_v41  ;;  %v659_v63 = vmul.f32 %v1103_v49, %v1509_v45 }
 0x236   :  { %696 = vadd.xlane.f32.xlu1 %v695_v56 }
 0x237   :  { %v1105_v51 = vpop.eup %1104  ;;  %v698_v4 = vsel %vm445_vm2, %v658_v44, 0.0  ;;  %v701_v0 = vsel %vm445_vm2, %v659_v63, 0.0 }
 0x238   :  { %699 = vadd.xlane.f32.xlu0 %v698_v4  ;;  %v660_v1 = vmul.f32 %v1105_v51, %v1513_v54  ;;  %v661_v3 = vmul.f32 %v1105_v51, %v1517_v5 }
 0x23a   :  { %702 = vadd.xlane.f32.xlu1 %v701_v0  ;;  %v704_v47 = vsel %vm445_vm2, %v660_v1, 0.0  ;;  %v707_v62 = vsel %vm445_vm2, %v661_v3, 0.0 }
 0x23c   :  { %705 = vadd.xlane.f32.xlu0 %v704_v47 }
 0x23e   :  { %708 = vadd.xlane.f32.xlu1 %v707_v62 }
 0x2a7   :  { %v664_v41 = vpop.xlane.xlu0 %663 }
 0x2a8   :  { %v711_v46 = vmul.f32 0.25, %v664_v41 }
 0x2aa   :  { %v727_v17 = vmul.f32 %v711_v46, %v1182_v9 }
 0x2ab   :  { %v667_v52 = vpop.xlane.xlu0 %666 }
 0x2ac   :  { %v712_v10 = vmul.f32 0.25, %v667_v52 }
 0x2ae   :  { %v728_v16 = vmul.f32 %v712_v10, %v1218_v25 }
 0x2af   :  { %v670_v45 = vpop.xlane.xlu1 %669 }
 0x2b0   :  { %v676_v18 = vpop.xlane.xlu0 %675  ;;  %v713_v12 = vmul.f32 0.25, %v670_v45  ;;  %v743_v40 = vadd.f32 %v728_v16, %v727_v17 }
 0x2b1   :  { %v715_v54 = vmul.f32 0.25, %v676_v18 }
 0x2b2   :  { %v729_v23 = vmul.f32 %v713_v12, %v1223_v26  ;;  %v744_v50 = vrot.slane %v743_v40, 4 }
 0x2b3   :  { %v673_v13 = vpop.xlane.xlu1 %672  ;;  %v731_v20 = vmul.f32 %v715_v54, %v1235_v28 }
 0x2b4   :  { %v714_v22 = vmul.f32 0.25, %v673_v13 }
 0x2b5   :  { %v682_v11 = vpop.xlane.xlu0 %681 }
 0x2b6   :  { %v730_v5 = vmul.f32 %v714_v22, %v1230_v27  ;;  %v717_v60 = vmul.f32 0.25, %v682_v11 }
 0x2b7   :  { %v679_v15 = vpop.xlane.xlu1 %678 }
 0x2b8   :  { %v716_v19 = vmul.f32 0.25, %v679_v15  ;;  %v750_v61 = vadd.f32 %v730_v5, %v729_v23  ;;  %v733_v27 = vmul.f32 %v717_v60, %v1247_v30  ;;  %v745_v30 = vadd.f32 %v744_v50, %v743_v40 }
 0x2ba   :  { %v732_v55 = vmul.f32 %v716_v19, %v1242_v29  ;;  %v688_v59 = vpop.xlane.xlu0 %687  ;;  %v751_v26 = vrot.slane %v750_v61, 4 }
 0x2bb   :  { %v685_v21 = vpop.xlane.xlu1 %684  ;;  %v719_v25 = vmul.f32 0.25, %v688_v59 }
 0x2bc   :  { %v718_v24 = vmul.f32 0.25, %v685_v21  ;;  %v757_v42 = vadd.f32 %v732_v55, %v731_v20  ;;  %v752_v57 = vadd.f32 %v751_v26, %v750_v61 }
 0x2bd   :  { %v735_v28 = vmul.f32 %v719_v25, %v1259_v32 }
 0x2be   :  { %v734_v43 = vmul.f32 %v718_v24, %v1254_v31  ;;  %v694_v14 = vpop.xlane.xlu0 %693  ;;  %v758_v9 = vrot.slane %v757_v42, 4  ;;  %v753_v3 = vrot.slane %v752_v57, 2 }
 0x2bf   :  { %v691_v48 = vpop.xlane.xlu1 %690  ;;  %v721_v8 = vmul.f32 0.25, %v694_v14 }
 0x2c0   :  { %v764_v7 = vadd.f32 %v734_v43, %v733_v27  ;;  %v720_v29 = vmul.f32 0.25, %v691_v48  ;;  %v759_v49 = vadd.f32 %v758_v9, %v757_v42  ;;  %v754_v12 = vadd.f32 %v753_v3, %v752_v57 }
 0x2c1   :  { %v737_v51 = vmul.f32 %v721_v8, %v1271_v34 }
 0x2c2   :  { %v765_v2 = vrot.slane %v764_v7, 4  ;;  %v736_v6 = vmul.f32 %v720_v29, %v1266_v33  ;;  %v746_v33 = vrot.slane %v745_v30, 2  ;;  %v760_v62 = vrot.slane %v759_v49, 2 }
 0x2c3   :  { %v697_v58 = vpop.xlane.xlu1 %696 }
 0x2c4   :  { %v771_v53 = vadd.f32 %v736_v6, %v735_v28  ;;  %v722_v31 = vmul.f32 0.25, %v697_v58  ;;  %v766_v56 = vadd.f32 %v765_v2, %v764_v7  ;;  %v747_v54 = vadd.f32 %v746_v33, %v745_v30 }
 0x2c5   :  { %v700_v63 = vpop.xlane.xlu0 %699  ;;  %v761_v15 = vadd.f32 %v760_v62, %v759_v49 }
 0x2c6   :  { %v772_v44 = vrot.slane %v771_v53, 4  ;;  %v738_v4 = vmul.f32 %v722_v31, %v1278_v35  ;;  %v723_v0 = vmul.f32 0.25, %v700_v63  ;;  %v767_v52 = vrot.slane %v766_v56, 2 }
 0x2c7   :  { %v703_v1 = vpop.xlane.xlu1 %702  ;;  %v762_v21 = vrot.slane %v761_v15, 1  ;;  %v748_v61 = vrot.slane %v747_v54, 1 }
 0x2c8   :  { %v773_v32 = vadd.f32 %v772_v44, %v771_v53  ;;  %v724_v47 = vmul.f32 0.25, %v703_v1  ;;  %v778_v41 = vadd.f32 %v738_v4, %v737_v51  ;;  %v739_v45 = vmul.f32 %v723_v0, %v1283_v36 }
 0x2c9   :  { %v706_v13 = vpop.xlane.xlu0 %705  ;;  %v768_v19 = vadd.f32 %v767_v52, %v766_v56 }
 0x2ca   :  { %v740_v18 = vmul.f32 %v724_v47, %v1290_v37  ;;  %v774_v22 = vrot.slane %v773_v32, 2  ;;  %v779_v10 = vrot.slane %v778_v41, 4  ;;  %v725_v11 = vmul.f32 0.25, %v706_v13 }
 0x2cb   :  { %v709_v34 = vpop.xlane.xlu1 %708  ;;  %v755_v37 = vrot.slane %v754_v12, 1  ;;  %v769_v24 = vrot.slane %v768_v19, 1 }
 0x2cc   :  { %v785_v35 = vadd.f32 %v740_v18, %v739_v45  ;;  %v726_v46 = vmul.f32 0.25, %v709_v34  ;;  %v780_v5 = vadd.f32 %v779_v10, %v778_v41  ;;  %v741_v23 = vmul.f32 %v725_v11, %v1295_v38 }
 0x2cd   :  { %v775_v36 = vadd.f32 %v774_v22, %v773_v32  ;;  %v756_v43 = vadd.f32 %v755_v37, %v754_v12  ;;  %v763_v38 = vadd.f32 %v762_v21, %v761_v15  ;;  %v770_v7 = vadd.f32 %v769_v24, %v768_v19 }
 0x2ce   :  { %v786_v16 = vrot.slane %v785_v35, 4  ;;  %v742_v55 = vmul.f32 %v726_v46, %v1302_v39  ;;  %v781_v60 = vrot.slane %v780_v5, 2  ;;  %v749_v39 = vadd.f32 %v748_v61, %v747_v54 }
 0x2cf   :  { %v776_v27 = vrot.slane %v775_v36, 1 }
 0x2d0   :  { %v787_v17 = vadd.f32 %v786_v16, %v785_v35  ;;  %v792_v20 = vadd.f32 %v742_v55, %v741_v23  ;;  %v782_v59 = vadd.f32 %v781_v60, %v780_v5  ;;  %v808_v9 = vsel %vm807_vm3, %v756_v43, %v749_v39 }
 0x2d1   :  { %v777_v50 = vadd.f32 %v776_v27, %v775_v36  ;;  %v810_v8 = vsel %vm809_vm4, %v763_v38, %v808_v9 }
 0x2d2   :  { %v788_v40 = vrot.slane %v787_v17, 2  ;;  %v793_v42 = vrot.slane %v792_v20, 4  ;;  %v783_v25 = vrot.slane %v782_v59, 1  ;;  %v812_v57 = vsel %vm811_vm5, %v770_v7, %v810_v8 }
 0x2d3   :  { %v814_v53 = vsel %vm813_vm6, %v777_v50, %v812_v57 }
 0x2d4   :  { %v789_v48 = vadd.f32 %v788_v40, %v787_v17  ;;  %v794_v26 = vadd.f32 %v793_v42, %v792_v20  ;;  %v784_v2 = vadd.f32 %v783_v25, %v782_v59 }
 0x2d6   :  { %v790_v29 = vrot.slane %v789_v48, 1  ;;  %v795_v14 = vrot.slane %v794_v26, 2  ;;  %v816_v49 = vsel %vm815_vm7, %v784_v2, %v814_v53 }
 0x2d8   :  { %v796_v28 = vadd.f32 %v795_v14, %v794_v26  ;;  %v791_v6 = vadd.f32 %v790_v29, %v789_v48 }
 0x2da   :  { %v797_v58 = vrot.slane %v796_v28, 1  ;;  %v818_v31 = vsel %vm817_vm8, %v791_v6, %v816_v49 }
 0x2dc   :  { %v798_v30 = vadd.f32 %v797_v58, %v796_v28 }
 0x2de   :  { %v820_v56 = vsel %vm819_vm9, %v798_v30, %v818_v31 }
 0x2df   :  { %822 = vst [vmem:[#allocation2] sm:$0xff] %v820_v56 }
 0x2e0   :  { %1117 = shalt.err (!%p1114_p4)
}
 0x2e1   :  { %s1118_s14 = scalar_lea.hbm %s1585_s5, 128 }
 0x2e2   :  { %p1119_p5 = scmp.ne.s32.totalorder %s1585_s5, %s1118_s14  ;;  %p1122_p6 = scmp.lt.u32.totalorder %s1118_s14, %s1585_s5 }
 0x2e4   :  { %p1124_p7 = pnand %p1122_p6, %p1119_p5 }
 0x2e6   :  { %1127 = shalt.err (!%p1124_p7)
}
 0x2e7   :  { %832 = dma.vmem_to_hbm [thread:$0]  %s830_s4, 128, %s1585_s5, [#allocation3]  }
 0x2e8   :  { %1128 = dma.done.wait [#allocation3], 128  }
 0x2e9   :  { %1129 = vsyncadd [#allocation3], 4294967168 }
 0x2ea   :  { %836 = vsyncpa [#allocation3], 1 }

</bundles_post_ra>
